<compile_context>
chip_gen: v7x
topology: tpu7x:2x2x1
jax: 0.10.0
libtpu: 0.0.40
codegen_flags: <defaults>
</compile_context>

<pallas_src>
import functools

import numpy as np

import jax
import jax.numpy as jnp
from jax.experimental import pallas as pl
from jax.experimental.pallas import tpu as pltpu


def _round_up(x, m):
    return ((x + m - 1) // m) * m


# ----------------------------------------------------------------------------
# Kernels: one (row-tile, K-block) step of  A_tile @ XW  with gate finalize.
# Scalar-prefetch refs (cb_ref: flattened col-block table, nz_ref: per-row-tile
# nonzero-block counts) come first; cb_ref is only used by the index_maps.
# ----------------------------------------------------------------------------
def _kernel_packed(cb_ref, nz_ref, a_ref, xw_ref, c_ref, gb_ref, out_ref, acc_ref):
    """Replicated-weight path (XW has 4*Fout lanes; one sigmoid pass)."""
    i = pl.program_id(0)
    k = pl.program_id(1)
    nk = pl.num_programs(1)

    @pl.when(k == 0)
    def _():
        acc_ref[...] = jnp.zeros_like(acc_ref)

    # Skip padded / all-zero column blocks of A_hat.
    @pl.when(k < nz_ref[i])
    def _():
        acc_ref[...] += jnp.dot(a_ref[...], xw_ref[...],
                                preferred_element_type=jnp.float32)

    @pl.when(k == nk - 1)
    def _():
        fo = c_ref.shape[-1]
        # Single EUP pass over full-width vregs; tanh(x) = 2*sigmoid(2x) - 1
        # (the factor 2 on the cell segment is folded into W4 / gb).
        g = jax.nn.sigmoid(acc_ref[...] + gb_ref[...])
        i_g = g[:, 0 * fo:1 * fo]
        f_g = g[:, 1 * fo:2 * fo]
        t_c = 2.0 * g[:, 2 * fo:3 * fo] - 1.0
        o_g = g[:, 3 * fo:4 * fo]
        c_new = f_g * c_ref[...] + i_g * t_c
        h_new = o_g * jnp.tanh(c_new)
        out_ref[:, 0 * fo:1 * fo] = o_g
        out_ref[:, 1 * fo:2 * fo] = h_new
        out_ref[:, 2 * fo:3 * fo] = c_new
        out_ref[:, 3 * fo:4 * fo] = i_g          # filler keeps the store 128-lane dense


def _kernel_shared(cb_ref, nz_ref, a_ref, xw_ref, c_ref, gb_ref, out_ref, acc_ref):
    """Shared-term path for wide Fout (XW has Fout lanes; no 4x MXU replication)."""
    i = pl.program_id(0)
    k = pl.program_id(1)
    nk = pl.num_programs(1)

    @pl.when(k == 0)
    def _():
        acc_ref[...] = jnp.zeros_like(acc_ref)

    @pl.when(k < nz_ref[i])
    def _():
        acc_ref[...] += jnp.dot(a_ref[...], xw_ref[...],
                                preferred_element_type=jnp.float32)

    @pl.when(k == nk - 1)
    def _():
        fo = c_ref.shape[-1]
        s = acc_ref[...]
        i_g = jax.nn.sigmoid(s + gb_ref[0:1, :])
        f_g = jax.nn.sigmoid(s + gb_ref[1:2, :])
        t_c = jnp.tanh(s + gb_ref[2:3, :])
        o_g = jax.nn.sigmoid(s + gb_ref[3:4, :])
        c_new = f_g * c_ref[...] + i_g * t_c
        h_new = o_g * jnp.tanh(c_new)
        out_ref[:, 0 * fo:1 * fo] = o_g
        out_ref[:, 1 * fo:2 * fo] = h_new
        out_ref[:, 2 * fo:3 * fo] = c_new
        out_ref[:, 3 * fo:4 * fo] = i_g


# ----------------------------------------------------------------------------
# Per-graph / per-parameter precompute (hoisted out of the timestep path)
# ----------------------------------------------------------------------------
def gcn_normalized_adjacency(edge_index, edge_weight, num_nodes):
    """Dense A_hat for GCNConv(add_self_loops=False, normalize=True)."""
    row, col = edge_index[0], edge_index[1]          # row = source, col = target
    if edge_weight is None:
        edge_weight = jnp.ones((row.shape[0],), dtype=jnp.float32)
    deg = jnp.zeros((num_nodes,), jnp.float32).at[col].add(edge_weight)
    deg_inv_sqrt = jnp.where(deg > 0, jax.lax.rsqrt(jnp.where(deg > 0, deg, 1.0)), 0.0)
    norm = deg_inv_sqrt[row] * edge_weight * deg_inv_sqrt[col]
    a_hat = jnp.zeros((num_nodes, num_nodes), jnp.float32).at[col, row].add(norm)
    return a_hat


def build_sparsity_plan(a_hat, *, row_tile=256, k_tile=512):
    """Eager (per-graph) tiling + block-sparsity plan for A_hat.

    Decides (tm, tk), zero-pads A_hat to whole tiles, and builds the scalar
    prefetch tables: for each row tile, the list of nonzero column blocks
    (padded to max_kb) and the nonzero-block count.
    """
    a = np.asarray(jax.device_get(a_hat), dtype=np.float32)
    n = a.shape[0]

    # Row tile: multiple of 8; split so the 'parallel' axis has >=2 iterations
    # when possible (keeps both v7x TensorCores busy).
    if n <= 8:
        tm = 8
    else:
        tm = min(row_tile, _round_up((n + 1) // 2, 8))
    n_rows_pad = _round_up(n, tm)

    # Contraction tile: multiple of 128 (or the full dim when it fits in one block).
    if n <= k_tile:
        tk = n
        n_cols_pad = n
    else:
        tk = k_tile
        n_cols_pad = _round_up(n, tk)

    n_row_blocks = n_rows_pad // tm
    n_col_blocks = n_cols_pad // tk

    a_pad = np.zeros((n_rows_pad, n_cols_pad), np.float32)
    a_pad[:n, :n] = a

    occ = np.zeros((n_row_blocks, n_col_blocks), dtype=bool)
    for i in range(n_row_blocks):
        rows = a_pad[i * tm:(i + 1) * tm]
        for j in range(n_col_blocks):
            occ[i, j] = bool(np.any(rows[:, j * tk:(j + 1) * tk] != 0.0))
    nnz = occ.sum(axis=1).astype(np.int32)
    max_kb = int(max(1, int(nnz.max()) if nnz.size else 1))
    col_blocks = np.zeros((n_row_blocks, max_kb), np.int32)   # pad entries -> block 0
    for i in range(n_row_blocks):
        idx = np.nonzero(occ[i])[0].astype(np.int32)
        col_blocks[i, :idx.shape[0]] = idx

    return dict(
        a_pad=jnp.asarray(a_pad),
        col_blocks=jnp.asarray(col_blocks.reshape(-1)),   # 1-D (SMEM-friendly)
        nnz=jnp.asarray(nnz),
        tm=tm, tk=tk, max_kb=max_kb,
        n=n, n_rows_pad=n_rows_pad, n_cols_pad=n_cols_pad,
    )


def fold_params(params, *, replicate):
    """Fold weights/biases once (hoisted).

    replicate=True  : W*x -> [Wx,Wx,2Wx,Wx], W*h -> [Wh,Wh,2Wh,Wh] and one
                      (1, 4*Fout) bias row (cell segment pre-scaled by 2).
    replicate=False : plain Wx, Wh and a (4, Fout) bias table [i; f; c; o].
    """
    wx, wh = params["wx"], params["wh"]
    b_sh = params["bx"] + params["bh"]                          # (1, Fout)
    if replicate:
        w_x = jnp.concatenate([wx, wx, 2.0 * wx, wx], axis=1)   # (Fin , 4*Fout)
        w_h = jnp.concatenate([wh, wh, 2.0 * wh, wh], axis=1)   # (Fout, 4*Fout)
        gb = jnp.concatenate(
            [b_sh + params["b_i"], b_sh + params["b_f"],
             2.0 * (b_sh + params["b_c"]), b_sh + params["b_o"]], axis=-1)
    else:
        w_x, w_h = wx, wh
        gb = jnp.concatenate(
            [b_sh + params["b_i"], b_sh + params["b_f"],
             b_sh + params["b_c"], b_sh + params["b_o"]], axis=0)
    return w_x, w_h, gb


# ----------------------------------------------------------------------------
# One timestep (plan + folded params are reused across steps)
# ----------------------------------------------------------------------------
def gconv_lstm_step(a_pad, col_blocks, nnz, x, H, C, w_x, w_h, gb, *,
                    n, fout, tm, tk, max_kb, n_rows_pad, n_cols_pad,
                    replicate, matmul_dtype=None):
    width = 4 * fout if replicate else fout

    # XW hoisted out of the grid: computed once per timestep (not per row tile),
    # structured as X@Wx + H@Wh so X and H are never concatenated.
    xw = (jnp.dot(x, w_x, preferred_element_type=jnp.float32)
          + jnp.dot(H, w_h, preferred_element_type=jnp.float32))      # (n, width)
    if n_cols_pad > n:
        xw = jnp.pad(xw, ((0, n_cols_pad - n), (0, 0)))
    c_in = C if n_rows_pad == n else jnp.pad(C, ((0, n_rows_pad - n), (0, 0)))

    a_op, xw_op = a_pad, xw
    if matmul_dtype is not None:
        # Opt-in bf16 MXU operands; accumulation and gate math stay f32.
        a_op = a_op.astype(matmul_dtype)
        xw_op = xw_op.astype(matmul_dtype)

    n_row_blocks = n_rows_pad // tm
    kernel = _kernel_packed if replicate else _kernel_shared

    def a_map(i, k, cb, nz):          # gather the k-th nonzero column block
        return (i, cb[i * max_kb + k])

    def xw_map(i, k, cb, nz):
        return (cb[i * max_kb + k], 0)

    packed = pl.pallas_call(
        kernel,
        out_shape=jax.ShapeDtypeStruct((n_rows_pad, 4 * fout), jnp.float32),
        grid_spec=pltpu.PrefetchScalarGridSpec(
            num_scalar_prefetch=2,
            grid=(n_row_blocks, max_kb),
            in_specs=[
                pl.BlockSpec((tm, tk), a_map),                       # A_hat tile
                pl.BlockSpec((tk, width), xw_map),                   # XW K-block
                pl.BlockSpec((tm, fout), lambda i, k, cb, nz: (i, 0)),   # C row tile
                pl.BlockSpec(gb.shape, lambda i, k, cb, nz: (0, 0)),     # gate biases
            ],
            out_specs=pl.BlockSpec((tm, 4 * fout), lambda i, k, cb, nz: (i, 0)),
            scratch_shapes=[pltpu.VMEM((tm, width), jnp.float32)],   # f32 accumulator
        ),
        compiler_params=pltpu.CompilerParams(
            dimension_semantics=("parallel", "arbitrary")),
    )(col_blocks, nnz, a_op, xw_op, c_in, gb)

    O = packed[:n, 0 * fout:1 * fout]
    h_new = packed[:n, 1 * fout:2 * fout]
    c_new = packed[:n, 2 * fout:3 * fout]
    return O, h_new, c_new


# ----------------------------------------------------------------------------
# Parameter init (matches PyG GCNConv reset + GConvLSTM_Simple._set_parameters)
# ----------------------------------------------------------------------------
def init_params(key, in_channels, out_channels):
    k1, k2 = jax.random.split(key)

    def glorot(k, shape):
        limit = (6.0 / (shape[0] + shape[1])) ** 0.5
        return jax.random.uniform(k, shape, jnp.float32, -limit, limit)

    return {
        "wx": glorot(k1, (in_channels, out_channels)),    # conv_x GCN weight
        "wh": glorot(k2, (out_channels, out_channels)),   # conv_h GCN weight
        "bx": jnp.zeros((1, out_channels), jnp.float32),  # conv_x GCN bias
        "bh": jnp.zeros((1, out_channels), jnp.float32),  # conv_h GCN bias
        "b_i": jnp.zeros((1, out_channels), jnp.float32),
        "b_f": jnp.zeros((1, out_channels), jnp.float32),
        "b_c": jnp.zeros((1, out_channels), jnp.float32),
        "b_o": jnp.zeros((1, out_channels), jnp.float32),
    }


def reference_step(a_hat, x, H, C, params):
    """Pure-JAX reference matching the PyTorch forward."""
    s = (a_hat @ (x @ params["wx"]) + params["bx"]
         + a_hat @ (H @ params["wh"]) + params["bh"])
    I = jax.nn.sigmoid(s + params["b_i"])
    Fg = jax.nn.sigmoid(s + params["b_f"])
    T = jnp.tanh(s + params["b_c"])
    Cn = Fg * C + I * T
    O = jax.nn.sigmoid(s + params["b_o"])
    Hn = O * jnp.tanh(Cn)
    return O, Hn, Cn


# ----------------------------------------------------------------------------
# Demo / self-test
# ----------------------------------------------------------------------------
def run_case(key, num_nodes, in_channels, out_channels, *,
             row_tile=256, k_tile=512, lane_pack_max=128):
    k_x, k_w, k_ew = jax.random.split(key, 3)

    x = jax.random.normal(k_x, (num_nodes, in_channels), jnp.float32)

    # Deterministic weighted ring graph, both directions.
    src = jnp.arange(num_nodes, dtype=jnp.int32)
    dst = (src + 1) % num_nodes
    edge_index = jnp.stack(
        [jnp.concatenate([src, dst]), jnp.concatenate([dst, src])], axis=0)
    edge_weight = jax.random.uniform(
        k_ew, (edge_index.shape[1],), jnp.float32, 0.5, 1.5)

    params = init_params(k_w, in_channels, out_channels)
    a_hat = gcn_normalized_adjacency(edge_index, edge_weight, num_nodes)

    # Hoisted per-graph / per-parameter precompute.
    plan = build_sparsity_plan(a_hat, row_tile=row_tile, k_tile=k_tile)
    replicate = (4 * out_channels <= lane_pack_max)
    w_x, w_h, gb = fold_params(params, replicate=replicate)

    step = jax.jit(functools.partial(
        gconv_lstm_step,
        n=num_nodes, fout=out_channels,
        tm=plan["tm"], tk=plan["tk"], max_kb=plan["max_kb"],
        n_rows_pad=plan["n_rows_pad"], n_cols_pad=plan["n_cols_pad"],
        replicate=replicate))

    H = jnp.zeros((num_nodes, out_channels), jnp.float32)
    C = jnp.zeros((num_nodes, out_channels), jnp.float32)

    # Two timesteps reusing the plan / folded params.
    O1, H1, C1 = step(plan["a_pad"], plan["col_blocks"], plan["nnz"],
                      x, H, C, w_x, w_h, gb)
    O2, H2, C2 = step(plan["a_pad"], plan["col_blocks"], plan["nnz"],
                      x, H1, C1, w_x, w_h, gb)
    jax.block_until_ready((O2, H2, C2))

    # Correctness vs. pure-JAX reference of the original module math.
    O1r, H1r, C1r = reference_step(a_hat, x, H, C, params)
    O2r, H2r, C2r = reference_step(a_hat, x, H1r, C1r, params)
    for got, ref in ((O1, O1r), (H1, H1r), (C1, C1r),
                     (O2, O2r), (H2, H2r), (C2, C2r)):
        assert got.shape == (num_nodes, out_channels)
        assert bool(jnp.all(jnp.isfinite(got)))
        err = float(jnp.max(jnp.abs(got - ref)))
        assert jnp.allclose(got, ref, atol=1e-4, rtol=1e-4), f"max abs err {err}"


if __name__ == "__main__":
    root = jax.random.PRNGKey(0)

    # 1) Module-sized demo (N=16, Fin=4, Fout=32): replicated-W path, 128-lane
    #    packed output, two row tiles (grid (2,1) -> both v7x TCs busy).
    run_case(root, 16, 4, 32)

    # 2) Wide Fout (128): shared-term path (replication would be a 4x MXU tax).
    run_case(jax.random.fold_in(root, 1), 40, 4, 128)

    # 3) Larger ring with small tiles: exercises the K-tiled accumulator and the
    #    scalar-prefetch-gathered block-sparse contraction over A_hat.
    run_case(jax.random.fold_in(root, 2), 192, 4, 32, row_tile=64, k_tile=128)

    print("KERNEL_OK")
</pallas_src>

<mosaic_0001>
module attributes {stable_mosaic.version = 11 : i64} {
  func.func @_kernel_packed(%arg0: i32, %arg1: i32, %arg2: memref<2xi32, #tpu.memory_space<smem>>, %arg3: memref<2xi32, #tpu.memory_space<smem>>, %arg4: memref<8x16xf32, #tpu.memory_space<vmem>>, %arg5: memref<16x128xf32, #tpu.memory_space<vmem>>, %arg6: memref<8x32xf32, #tpu.memory_space<vmem>>, %arg7: memref<1x128xf32, #tpu.memory_space<vmem>>, %arg8: memref<8x128xf32, #tpu.memory_space<vmem>>, %arg9: memref<8x128xf32, #tpu.memory_space<vmem>>) attributes {dimension_semantics = [#tpu.dimension_semantics<parallel>, #tpu.dimension_semantics<arbitrary>], iteration_bounds = array<i64: 2, 1>, scalar_prefetch = 2 : i64, scratch_operands = 1 : i64, tpu.core_type = #tpu.core_type<tc>, window_params = [{transform_indices = @transform_0, window_bounds = array<i64: 8, 16>}, {transform_indices = @transform_1, window_bounds = array<i64: 16, 128>}, {transform_indices = @transform_2, window_bounds = array<i64: 8, 32>}, {pipeline_mode = #tpu.pipeline_mode<synchronous>, transform_indices = @transform_3, window_bounds = array<i64: 1, 128>}, {transform_indices = @transform_4, window_bounds = array<i64: 8, 128>}]} {
    %c0_i32 = arith.constant 0 : i32
    %0 = arith.cmpi eq, %arg1, %c0_i32 : i32
    %1 = arith.extui %0 : i1 to i32
    %c0_i32_0 = arith.constant 0 : i32
    %2 = arith.cmpi ne, %1, %c0_i32_0 : i32
    scf.if %2 {
      %cst = arith.constant 0.000000e+00 : f32
      %11 = vector.broadcast %cst : f32 to vector<8x128xf32>
      %c0 = arith.constant 0 : index
      %c0_4 = arith.constant 0 : index
      %12 = vector.load %arg9[%c0, %c0_4] : memref<8x128xf32, #tpu.memory_space<vmem>>, vector<8x128xf32>
      tpu.vector_store %arg9[%c0, %c0_4], %11 {strides = array<i32>} : memref<8x128xf32, #tpu.memory_space<vmem>>, vector<8x128xf32>,
    } else {
    }
    %3 = arith.index_cast %arg0 : i32 to index
    %4 = memref.load %arg3[%3] : memref<2xi32, #tpu.memory_space<smem>>
    %5 = arith.cmpi slt, %arg1, %4 : i32
    %6 = arith.extui %5 : i1 to i32
    %c0_i32_1 = arith.constant 0 : i32
    %7 = arith.cmpi ne, %6, %c0_i32_1 : i32
    scf.if %7 {
      %c0 = arith.constant 0 : index
      %c0_4 = arith.constant 0 : index
      %11 = vector.load %arg9[%c0, %c0_4] : memref<8x128xf32, #tpu.memory_space<vmem>>, vector<8x128xf32>
      %c0_5 = arith.constant 0 : index
      %c0_6 = arith.constant 0 : index
      %12 = vector.load %arg4[%c0_5, %c0_6] : memref<8x16xf32, #tpu.memory_space<vmem>>, vector<8x16xf32>
      %c0_7 = arith.constant 0 : index
      %c0_8 = arith.constant 0 : index
      %13 = vector.load %arg5[%c0_7, %c0_8] : memref<16x128xf32, #tpu.memory_space<vmem>>, vector<16x128xf32>
      %cst = arith.constant dense<0.000000e+00> : vector<8x128xf32>
      %14 = tpu.matmul %12, %13, %cst {dimension_numbers = #tpu.dot_dimension_numbers<[1], [0], [0], [1], [0, 0, 1, 1], [], []>} : vector<8x16xf32>, vector<16x128xf32>, vector<8x128xf32> -> vector<8x128xf32>
      %15 = arith.addf %11, %14 : vector<8x128xf32>
      %c0_9 = arith.constant 0 : index
      %c0_10 = arith.constant 0 : index
      %16 = vector.load %arg9[%c0_9, %c0_10] : memref<8x128xf32, #tpu.memory_space<vmem>>, vector<8x128xf32>
      tpu.vector_store %arg9[%c0_9, %c0_10], %15 {strides = array<i32>} : memref<8x128xf32, #tpu.memory_space<vmem>>, vector<8x128xf32>,
    } else {
    }
    %c0_i32_2 = arith.constant 0 : i32
    %8 = arith.cmpi eq, %arg1, %c0_i32_2 : i32
    %9 = arith.extui %8 : i1 to i32
    %c0_i32_3 = arith.constant 0 : i32
    %10 = arith.cmpi ne, %9, %c0_i32_3 : i32
    scf.if %10 {
      %c0 = arith.constant 0 : index
      %c0_4 = arith.constant 0 : index
      %11 = vector.load %arg9[%c0, %c0_4] : memref<8x128xf32, #tpu.memory_space<vmem>>, vector<8x128xf32>
      %c0_5 = arith.constant 0 : index
      %c0_6 = arith.constant 0 : index
      %12 = vector.load %arg7[%c0_5, %c0_6] : memref<1x128xf32, #tpu.memory_space<vmem>>, vector<1x128xf32>
      %13 = vector.broadcast %12 : vector<1x128xf32> to vector<8x128xf32>
      %14 = arith.addf %11, %13 : vector<8x128xf32>
      %15 = arith.negf %14 : vector<8x128xf32>
      %16 = math.exp %15 : vector<8x128xf32>
      %cst = arith.constant 1.000000e+00 : f32
      %17 = vector.broadcast %cst : f32 to vector<8x128xf32>
      %18 = arith.addf %17, %16 : vector<8x128xf32>
      %19 = arith.divf %17, %18 : vector<8x128xf32>
      %20 = vector.extract_strided_slice %19 {offsets = [0, 0], sizes = [8, 32], strides = [1, 1]} : vector<8x128xf32> to vector<8x32xf32>
      %21 = vector.extract_strided_slice %19 {offsets = [0, 32], sizes = [8, 32], strides = [1, 1]} : vector<8x128xf32> to vector<8x32xf32>
      %22 = vector.extract_strided_slice %19 {offsets = [0, 64], sizes = [8, 32], strides = [1, 1]} : vector<8x128xf32> to vector<8x32xf32>
      %cst_7 = arith.constant 2.000000e+00 : f32
      %23 = vector.broadcast %cst_7 : f32 to vector<8x32xf32>
      %24 = arith.mulf %23, %22 : vector<8x32xf32>
      %cst_8 = arith.constant 1.000000e+00 : f32
      %25 = vector.broadcast %cst_8 : f32 to vector<8x32xf32>
      %26 = arith.subf %24, %25 : vector<8x32xf32>
      %27 = vector.extract_strided_slice %19 {offsets = [0, 96], sizes = [8, 32], strides = [1, 1]} : vector<8x128xf32> to vector<8x32xf32>
      %c0_9 = arith.constant 0 : index
      %c0_10 = arith.constant 0 : index
      %28 = vector.load %arg6[%c0_9, %c0_10] : memref<8x32xf32, #tpu.memory_space<vmem>>, vector<8x32xf32>
      %29 = arith.mulf %21, %28 : vector<8x32xf32>
      %30 = arith.mulf %20, %26 : vector<8x32xf32>
      %31 = arith.addf %29, %30 : vector<8x32xf32>
      %32 = math.tanh %31 : vector<8x32xf32>
      %33 = arith.mulf %27, %32 : vector<8x32xf32>
      %c0_11 = arith.constant 0 : index
      %c0_12 = arith.constant 0 : index
      %34 = vector.load %arg8[%c0_11, %c0_12] : memref<8x128xf32, #tpu.memory_space<vmem>>, vector<8x32xf32>
      tpu.vector_store %arg8[%c0_11, %c0_12], %27 {strides = array<i32>} : memref<8x128xf32, #tpu.memory_space<vmem>>, vector<8x32xf32>,
      %c0_13 = arith.constant 0 : index
      %c32 = arith.constant 32 : index
      %35 = vector.load %arg8[%c0_13, %c32] : memref<8x128xf32, #tpu.memory_space<vmem>>, vector<8x32xf32>
      tpu.vector_store %arg8[%c0_13, %c32], %33 {strides = array<i32>} : memref<8x128xf32, #tpu.memory_space<vmem>>, vector<8x32xf32>,
      %c0_14 = arith.constant 0 : index
      %c64 = arith.constant 64 : index
      %36 = vector.load %arg8[%c0_14, %c64] : memref<8x128xf32, #tpu.memory_space<vmem>>, vector<8x32xf32>
      tpu.vector_store %arg8[%c0_14, %c64], %31 {strides = array<i32>} : memref<8x128xf32, #tpu.memory_space<vmem>>, vector<8x32xf32>,
      %c0_15 = arith.constant 0 : index
      %c96 = arith.constant 96 : index
      %37 = vector.load %arg8[%c0_15, %c96] : memref<8x128xf32, #tpu.memory_space<vmem>>, vector<8x32xf32>
      tpu.vector_store %arg8[%c0_15, %c96], %20 {strides = array<i32>} : memref<8x128xf32, #tpu.memory_space<vmem>>, vector<8x32xf32>,
    } else {
    }
    return
  }
  func.func @transform_0(%arg0: i32, %arg1: i32, %arg2: memref<2xi32, #tpu.memory_space<smem>>, %arg3: memref<2xi32, #tpu.memory_space<smem>>) -> (i32, i32) {
    %c1_i32 = arith.constant 1 : i32
    %0 = arith.muli %arg0, %c1_i32 : i32
    %1 = arith.addi %0, %arg1 : i32
    %2 = arith.index_cast %1 : i32 to index
    %3 = memref.load %arg2[%2] : memref<2xi32, #tpu.memory_space<smem>>
    %c0_i32 = arith.constant 0 : i32
    return %arg0, %3 : i32, i32
  }
  func.func @transform_1(%arg0: i32, %arg1: i32, %arg2: memref<2xi32, #tpu.memory_space<smem>>, %arg3: memref<2xi32, #tpu.memory_space<smem>>) -> (i32, i32) {
    %c1_i32 = arith.constant 1 : i32
    %0 = arith.muli %arg0, %c1_i32 : i32
    %1 = arith.addi %0, %arg1 : i32
    %2 = arith.index_cast %1 : i32 to index
    %3 = memref.load %arg2[%2] : memref<2xi32, #tpu.memory_space<smem>>
    %c0_i32 = arith.constant 0 : i32
    %c0_i32_0 = arith.constant 0 : i32
    return %3, %c0_i32 : i32, i32
  }
  func.func @transform_2(%arg0: i32, %arg1: i32, %arg2: memref<2xi32, #tpu.memory_space<smem>>, %arg3: memref<2xi32, #tpu.memory_space<smem>>) -> (i32, i32) {
    %c0_i32 = arith.constant 0 : i32
    %c0_i32_0 = arith.constant 0 : i32
    return %arg0, %c0_i32 : i32, i32
  }
  func.func @transform_3(%arg0: i32, %arg1: i32, %arg2: memref<2xi32, #tpu.memory_space<smem>>, %arg3: memref<2xi32, #tpu.memory_space<smem>>) -> (i32, i32) {
    %c0_i32 = arith.constant 0 : i32
    %c0_i32_0 = arith.constant 0 : i32
    %c0_i32_1 = arith.constant 0 : i32
    return %c0_i32, %c0_i32_0 : i32, i32
  }
  func.func @transform_4(%arg0: i32, %arg1: i32, %arg2: memref<2xi32, #tpu.memory_space<smem>>, %arg3: memref<2xi32, #tpu.memory_space<smem>>) -> (i32, i32) {
    %c0_i32 = arith.constant 0 : i32
    %c0_i32_0 = arith.constant 0 : i32
    return %arg0, %c0_i32 : i32, i32
  }
}

</mosaic_0001>

<bundles_post_ra>
// kernel: gconv_lstm_step.1
= control target key start
LH: loop header
LB: loop body
LE: loop exit
PB: predicated region body
PF: predicated region fallthrough
CT: control target
= control target key end

     0   :  { %s759_s0 = inlined_call_operand.vmem [shape: s32[2], index: 0, kind: input, shape index: {}]   ;;  %s760_s2 = inlined_call_operand.vmem [shape: f32[16,16], index: 2, kind: input, shape index: {}]   ;;  %s761_s3 = inlined_call_operand.vmem [shape: f32[16,128], index: 3, kind: input, shape index: {}]   ;;  %s762_s4 = inlined_call_operand.vmem [shape: f32[16,32], index: 4, kind: input, shape index: {}]   ;;  %s763_s5 = inlined_call_operand.vmem [shape: f32[1,128], index: 5, kind: input, shape index: {}]   ;;  %s764_s6 = inlined_call_operand.vmem [shape: f32[16,128], index: 6, kind: output, shape index: {}]   ;;  %s765_s1 = inlined_call_operand.vmem [shape: s32[2], index: 1, kind: input, shape index: {}]  }
   0x1   :  { %s11_s23 = sshll.u32 %s759_s0, 4  ;;  %s15_s26 = sshll.u32 %s765_s1, 4  ;;  %s12_s23 = int_to_ptr.vmem [resolvable:$true] %s11_s23  ;;  %s16_s26 = int_to_ptr.vmem [resolvable:$true] %s15_s26 }
   0x2   :  { %s608_s27 = scalar_lea.vmem %s12_s23, 16  ;;  %p613_p1 = scmp.lt.s32.totalorder %s12_s23, %s12_s23 }
   0x3   :  { %p609_p0 = scmp.ne.s32.totalorder %s12_s23, %s608_s27  ;;  %p614_p2 = scmp.lt.s32.totalorder %s608_s27, %s608_s27 }
   0x5   :  { %p615_p3 = por %p614_p2, %p613_p1 }
   0x7   :  { %p616_p4 = pnand %p615_p3, %p609_p0 }
   0x9   :  { %619 = shalt.err (!%p616_p4)  }
   0xa   :  { %s658_s28 = smov [#allocation4]   ;;  %s620_s29 = scalar_lea.vmem %s16_s26, 16 }
   0xb   :  { %14 = dma.vmem_to_smem %s12_s23, 16, %s658_s28, [#allocation3] }
   0xc   :  { %p621_p5 = scmp.ne.s32.totalorder %s16_s26, %s620_s29  ;;  %p625_p6 = scmp.lt.s32.totalorder %s16_s26, %s16_s26 }
   0xd   :  { %p626_p7 = scmp.lt.s32.totalorder %s620_s29, %s620_s29 }
   0xf   :  { %p627_p8 = por %p626_p7, %p625_p6 }
  0x11   :  { %p628_p9 = pnand %p627_p8, %p621_p5 }
  0x13   :  { %631 = shalt.err (!%p628_p9)  }
  0x14   :  { %s659_s0 = smov [#allocation5]  }
  0x15   :  { %18 = dma.vmem_to_smem %s16_s26, 16, %s659_s0, [#allocation3] }
  0x16   :  { %644 = dma.done.wait [#allocation3], 32 }
  0x17   :  { %645 = vsyncadd [#allocation3], 4294967264 }
  0x18   :  { %20 = sfence }
  0x19   :  { %s708_s1 = smov 0   ;;  %s710_s30 = smov 0  }
  0x1a   :  { %s712_s7 = smov 0  }
  0x1b LB: > { %s38_s8 = sadd.s32 1, %s652_s30  ;;  %p542_p10 = scmp.ge.s32.totalorder %s656_s7, 1  ;;  %s656_s7 = sphi %s712_s7, %s26_s7   ;;  %s652_s30 = sphi %s710_s30, %s767_s30   ;;  %s648_s1 = sphi %s708_s1, %s766_s1  }
  0x1c   : > { %p40_p11 = scmp.ge.s32.totalorder %s38_s8, 2  ;;  %p226_p12 = scmp.lt.s32.totalorder %s656_s7, 3 }
  0x1e   : > { %s769_s8 = smov (%p40_p11, %s38_s8), 0  ;;  %p227_p13 = pnand %p542_p10, %p226_p12 }
  0x1f   : > { %s267_s9 = sld [smem:[#allocation4 + %s648_s1]] (!%p227_p13)  ;;  %p268_p0 = scmp.lt.s32.totalorder (!%p227_p13), %s648_s1, 1  ;;  %v660_v0 = vmov (!%p227_p13), 0.0  }
  0x20   : > { %230 = sbr.rel (%p227_p13) target bundleno = 788 (0x314), region = 36  ;;  %s278_s10 = sld [smem:[#allocation4 + %s648_s1]] (!%p227_p13)  ;;  %299 = vst [vmem:[#allocation2] sm:$0xff] (!%p227_p13), %v660_v0 }
  0x21   : > { %s300_s11 = sld [smem:[#allocation5 + %s648_s1]] (!%p227_p13) }
  0x25   : > { %p270_p1 = scmp.lt.s32.totalorder (!%p227_p13), %s267_s9, 0 }
  0x26   : > { %s544_s19 = sshll.u32 (!%p227_p13), %s278_s10, 1 }
  0x27   : > { %s771_s1 = smov (!%p268_p0, %s648_s1), 1  ;;  %s773_s9 = smov (!%p270_p1, %s267_s9), 0 }
  0x28   : > { %s546_s12 = sshll.u32 %s771_s1, 3  ;;  %p280_p2 = scmp.lt.s32.totalorder %s544_s19, 1 }
  0x29   : > { %s729_s15 = scalar_lea.vmem %s762_s4, %s546_s12  ;;  %s734_s18 = scalar_lea.vmem %s764_s6, %s546_s12 }
  0x2a   : > { %s272_s20 = sadd.s32 %s773_s9, %s771_s1  ;;  %s775_s19 = smov (!%p280_p2, %s544_s19), 1 }
  0x2b   : > { %s543_s21 = sshll.u32 %s272_s20, 3  ;;  %s545_s25 = sshll.u32 %s775_s19, 3 }
  0x2c   : > { %s274_s24 = scalar_lea.vmem %s760_s2, %s543_s21  ;;  %s283_s28 = scalar_lea.vmem %s761_s3, %s545_s25 }
  0x2d   : > { %p549_p3 = scmp.le.s32.totalorder %s300_s11, 0 }
  0x2e   : > { %v307_v1 = vld [vmem:[%s283_s28] sm:$0xff] (!%p549_p3)  ;;  %v308_v2 = vld [vmem:[%s283_s28 + $0x8] sm:$0xff] (!%p549_p3)  ;;  %v661_v3 = vmov (!%p549_p3), 0.0|0.0   ;;  %vm662_vm0 = vmmov (!%p549_p3), 0   ;;  %v663_v5 = vmov (!%p549_p3), 0.0   ;;  %vm309_vm1 = vcmask (!%p549_p3), 130048  }
  0x2f   : > { %304 = sbr.rel (%p549_p3) target bundleno = 267 (0x10b), region = 44  ;;  %566 = vmatprep.subr.bf16.mxu0 (!%p549_p3), %v661_v3  ;;  %v567_v4 = vpack.c.bf16 (!%p549_p3), %v308_v2, %v307_v1  ;;  %563 = vmatprep.mubr.msk.f32.mxu0 (!%p549_p3), %vm662_vm0, %v663_v5  ;;  %v306_v6 = vld [vmem:[%s274_s24] sm:$0xff] (!%p549_p3) }
  0x30   : > { %v305_v7 = vld [vmem:[#allocation2] sm:$0xff] (!%p549_p3) }
  0x31   : > { %568 = vmatpush3.bf16.msra.mxu0 (!%p549_p3), %v567_v4 }
  0x34   : > { %564 = vmatmul.mubr.msk.f32.vlgmr.msra.gmra.mrb[0].mxu0 (!%p549_p3), %vm309_vm1, %v306_v6 }
 0x107   : > { %v379_v8 = vpop.f32.mrb[0].mxu0 }
 0x108   : > { %v383_v9 = vadd.f32 %v379_v8, %v305_v7  ;;  %v565_v10 = vpop.f32.mrb[1].mxu0 }
 0x10a   : > { %384 = vst [vmem:[#allocation2] sm:$0xff] %v383_v9 }
 0x10b PF: > { %v551_v12 = vld [vmem:[%s763_s5] ss:$0 sm:$0xff]  ;;  %s664_s1 = smov 64   ;;  %s665_s9 = smov 32   ;;  %vm431_vm2 = vcmask 261120   ;;  %vm437_vm3 = vcmask 523520  }
 0x10c   : > { %v405_v20 = vld [vmem:[%s729_s15] sm:$0xff]  ;;  %s666_s10 = smov 96   ;;  %vm443_vm4 = vcmask 785920   ;;  %vm448_vm5 = vcmask 1048320  }
 0x111   : > { %v388_v11 = vld [vmem:[#allocation2] sm:$0xff] }
 0x112   : > { %v396_v13 = vadd.f32 %v551_v12, %v388_v11 }
 0x114   : > { %v552_v14 = vmul.f32 -1.442695, %v396_v13 }
 0x116   : > { %602 = vpow2.f32 %v552_v14 }
 0x120   : > { %v603_v15 = vpop.eup %602 }
 0x121   : > { %v400_v16 = vadd.f32 1.0, %v603_v15 }
 0x123   : > { %604 = vrcp.f32 %v400_v16 }
 0x12d   : > { %v605_v17 = vpop.eup %604 }
 0x12e   : > { %v403_v18 = vmul.f32 2.0, %v605_v17 }
 0x130   : > { %v553_v19 = vadd.f32 -1.0, %v403_v18 }
 0x132   : > { %412 = vrot.lane.b32.xlu0 %v553_v19, %s664_s1 }
 0x136   : > { %407 = vrot.lane.b32.xlu0 %v405_v20, %s665_s9 }
 0x13a   : > { %428 = vrot.lane.b32.xlu0 %v605_v17, %s665_s9 }
 0x1a4   : > { %v413_v21 = vpop.permute.xlu0 %412 }
 0x1a5   : > { %v415_v22 = vmul.f32 %v605_v17, %v413_v21 }
 0x1a7   : > { %417 = vrot.lane.b32.xlu1 %v415_v22, %s665_s9 }
 0x1a8   : > { %v408_v23 = vpop.permute.xlu0 %407 }
 0x1a9   : > { %v410_v25 = vmul.f32 %v605_v17, %v408_v23 }
 0x1ac   : > { %v429_v24 = vpop.permute.xlu0 %428 }
 0x1ad   : > { %432 = vst.msk [vmem:[%s734_s18] sm:$0xff] %vm431_vm2, %v429_v24 }
 0x219   : > { %v418_v26 = vpop.permute.xlu1 %417 }
 0x21a   : > { %v420_v27 = vadd.f32 %v418_v26, %v410_v25 }
 0x21c   : > { %606 = vtanh.f32 %v420_v27  ;;  %440 = vrot.lane.b32.xlu0 %v420_v27, %s665_s9 }
 0x226   : > { %v607_v28 = vpop.eup %606 }
 0x227   : > { %423 = vrot.lane.b32.xlu1 %v607_v28, %s664_s1 }
 0x28e   : > { %v441_v32 = vpop.permute.xlu0 %440 }
 0x299   : > { %v424_v29 = vpop.permute.xlu1 %423 }
 0x29a   : > { %v426_v30 = vmul.f32 %v605_v17, %v424_v29 }
 0x29c   : > { %434 = vrot.lane.b32.xlu1 %v426_v30, %s664_s1 }
 0x2a0   : > { %445 = vrot.lane.b32.xlu1 %v605_v17, %s666_s10 }
 0x30e   : > { %v435_v31 = vpop.permute.xlu1 %434 }
 0x30f   : > { %438 = vst.msk [vmem:[%s734_s18] sm:$0xff] %vm437_vm3, %v435_v31 }
 0x310   : > { %444 = vst.msk [vmem:[%s734_s18] sm:$0xff] %vm443_vm4, %v441_v32 }
 0x312   : > { %v446_v33 = vpop.permute.xlu1 %445 }
 0x313   : > { %449 = vst.msk [vmem:[%s734_s18] sm:$0xff] %vm448_vm5, %v446_v33 }
 0x314 PF: > { %s26_s7 = sadd.s32 1, %s656_s7   ;;  %s766_s1 = smov %s652_s30 }
 0x315   : > { %p23_p4 = scmp.ge.s32.totalorder %s26_s7, 4   ;;  %s767_s30 = smov %s769_s8 }
 0x317   :  { %25 = sbr.rel (!%p23_p4) target bundleno = 27 (0x1b), region = 84 }

</bundles_post_ra>
